<compile_context>
chip_gen: v5e
topology: v5e:2x2
jax: 0.10.0
libtpu: 0.0.40
codegen_flags: <defaults>
</compile_context>

<pallas_src>
from functools import partial

import jax
import jax.numpy as jnp
from jax import lax
from jax.experimental import pallas as pl
from jax.experimental.pallas import tpu as pltpu


def _round_up(x, m):
    return ((x + m - 1) // m) * m


def classifier_kernel(x_ref, w_ref, b_ref, o_ref):
    # x: (TB, H)   w: (O_pad, H)   b: (1, O_pad)   o: (TB, O_pad)
    x = x_ref[...]
    w = w_ref[...]

    # Linear: contract on H directly ((TB,H) . (O_pad,H) -> (TB,O_pad)),
    # f32 MXU accumulator, then bias add in f32.
    logits = lax.dot_general(
        x, w,
        dimension_numbers=(((1,), (1,)), ((), ())),
        preferred_element_type=jnp.float32,
    ) + b_ref[...].astype(jnp.float32)

    # Numerically stable LogSoftmax along the last axis, all in f32.
    # Padded columns carry bias = -1e30 -> never the max, exp() underflows to 0.
    m = jnp.max(logits, axis=-1, keepdims=True)
    shifted = logits - m
    lse = jnp.log(jnp.sum(jnp.exp(shifted), axis=-1, keepdims=True))
    o_ref[...] = (shifted - lse).astype(o_ref.dtype)


@partial(jax.jit, static_argnames=("tb",))
def classifier_forward(x, weight, bias, *, tb=256):
    """x: (B, H), weight: (O, H), bias: (O,) -> (B, O) log-probabilities."""
    B, H = x.shape
    O = weight.shape[0]

    # Lane-dense output: pad O up to a multiple of 128.
    O_pad = _round_up(max(O, 128), 128)
    # Batch tile: multiple of 8 sublanes, capped at `tb`; batch padded to a
    # whole number of tiles.
    TB = min(tb, _round_up(B, 8))
    B_pad = _round_up(B, TB)
    grid = (B_pad // TB,)

    x_p = x if B_pad == B else jnp.pad(x, ((0, B_pad - B), (0, 0)))
    w_p = weight if O_pad == O else jnp.pad(weight, ((0, O_pad - O), (0, 0)))
    # Padded bias columns get a huge negative value -> exp() == 0 in softmax.
    b_p = jnp.pad(bias, (0, O_pad - O), constant_values=-1e30).reshape(1, O_pad)

    # TODO(synk): for very large output_size, additionally tile O and switch to
    # an online two-pass max / sum-exp with a VMEM scratch accumulator so the
    # resident weight slab fits v7x's 64 MiB VMEM.

    bytes_f32 = 4
    cost = pl.CostEstimate(
        flops=2 * B_pad * H * O_pad,
        transcendentals=B_pad * O_pad,
        bytes_accessed=bytes_f32 * (B_pad * H + O_pad * H + O_pad
                                    + B_pad * O_pad),
    )

    # Raise the scoped VMEM limit only when the resident weight + the
    # double-buffered x / out tiles would exceed the ~32 MiB default.
    # (Double-count everything the pipeliner may hold two copies of.)
    vmem_est = bytes_f32 * (2 * (TB * H + TB * O_pad) + 2 * (O_pad * H + O_pad))
    vmem_limit = None
    if vmem_est > (30 << 20):
        vmem_limit = min(int(vmem_est * 1.25), 60 << 20)

    out_p = pl.pallas_call(
        classifier_kernel,
        out_shape=jax.ShapeDtypeStruct((B_pad, O_pad), jnp.float32),
        grid_spec=pltpu.PrefetchScalarGridSpec(
            num_scalar_prefetch=0,
            grid=grid,
            in_specs=[
                pl.BlockSpec((TB, H), lambda i: (i, 0)),       # x: streamed
                pl.BlockSpec((O_pad, H), lambda i: (0, 0)),    # W: resident
                pl.BlockSpec((1, O_pad), lambda i: (0, 0)),    # b: resident
            ],
            out_specs=pl.BlockSpec((TB, O_pad), lambda i: (i, 0)),
        ),
        compiler_params=pltpu.CompilerParams(
            dimension_semantics=("parallel",),
            vmem_limit_bytes=vmem_limit,
        ),
        cost_estimate=cost,
    )(x_p, w_p, b_p)

    return out_p[:B, :O]


if __name__ == "__main__":
    hidden_size = 32
    output_size = 8
    batch = 2

    key = jax.random.PRNGKey(0)
    kx, kw, kb = jax.random.split(key, 3)

    # Deterministic params, PyTorch-style uniform(-1/sqrt(H), 1/sqrt(H)) init.
    bound = 1.0 / jnp.sqrt(jnp.float32(hidden_size))
    weight = jax.random.uniform(kw, (output_size, hidden_size),
                                dtype=jnp.float32, minval=-bound, maxval=bound)
    bias = jax.random.uniform(kb, (output_size,),
                              dtype=jnp.float32, minval=-bound, maxval=bound)

    hidden = jax.random.normal(kx, (batch, hidden_size), dtype=jnp.float32)

    out = classifier_forward(hidden, weight, bias)
    jax.block_until_ready(out)

    # Reference check in plain JAX (same math as nn.Linear + LogSoftmax(dim=1)).
    ref_logits = hidden @ weight.T + bias
    ref = jax.nn.log_softmax(ref_logits, axis=1)
    assert out.shape == ref.shape, "shape mismatch vs reference"
    assert jnp.allclose(out, ref, atol=1e-5, rtol=1e-5), "mismatch vs reference"

    print("KERNEL_OK")
</pallas_src>

<mosaic_0001>
module attributes {stable_mosaic.version = 11 : i64} {
  func.func @classifier_kernel(%arg0: i32, %arg1: memref<8x32xf32, #tpu.memory_space<vmem>>, %arg2: memref<128x32xf32, #tpu.memory_space<vmem>>, %arg3: memref<1x128xf32, #tpu.memory_space<vmem>>, %arg4: memref<8x128xf32, #tpu.memory_space<vmem>>) attributes {dimension_semantics = [#tpu.dimension_semantics<parallel>], iteration_bounds = array<i64: 1>, scalar_prefetch = 0 : i64, scratch_operands = 0 : i64, tpu.core_type = #tpu.core_type<tc>, window_params = [{transform_indices = @transform_0, window_bounds = array<i64: 8, 32>}, {pipeline_mode = #tpu.pipeline_mode<synchronous>, transform_indices = @transform_1, window_bounds = array<i64: 128, 32>}, {pipeline_mode = #tpu.pipeline_mode<synchronous>, transform_indices = @transform_2, window_bounds = array<i64: 1, 128>}, {transform_indices = @transform_3, window_bounds = array<i64: 8, 128>}]} {
    %c0 = arith.constant 0 : index
    %c0_0 = arith.constant 0 : index
    %0 = vector.load %arg1[%c0, %c0_0] : memref<8x32xf32, #tpu.memory_space<vmem>>, vector<8x32xf32>
    %c0_1 = arith.constant 0 : index
    %c0_2 = arith.constant 0 : index
    %1 = vector.load %arg2[%c0_1, %c0_2] : memref<128x32xf32, #tpu.memory_space<vmem>>, vector<128x32xf32>
    %cst = arith.constant dense<0.000000e+00> : vector<8x128xf32>
    %2 = tpu.matmul %0, %1, %cst {dimension_numbers = #tpu.dot_dimension_numbers<[1], [1], [0], [0], [0, 0, 1, 0], [], []>} : vector<8x32xf32>, vector<128x32xf32>, vector<8x128xf32> -> vector<8x128xf32>
    %c0_3 = arith.constant 0 : index
    %c0_4 = arith.constant 0 : index
    %3 = vector.load %arg3[%c0_3, %c0_4] : memref<1x128xf32, #tpu.memory_space<vmem>>, vector<1x128xf32>
    %4 = vector.broadcast %3 : vector<1x128xf32> to vector<8x128xf32>
    %5 = arith.addf %2, %4 : vector<8x128xf32>
    %cst_5 = arith.constant dense<0xFF800000> : vector<8xf32>
    %6 = vector.multi_reduction <maximumf>, %5, %cst_5 [1] : vector<8x128xf32> to vector<8xf32>
    %7 = vector.shape_cast %6 : vector<8xf32> to vector<8x1xf32>
    %8 = vector.broadcast %7 : vector<8x1xf32> to vector<8x128xf32>
    %9 = arith.subf %5, %8 : vector<8x128xf32>
    %10 = math.exp %9 : vector<8x128xf32>
    %cst_6 = arith.constant dense<0.000000e+00> : vector<8xf32>
    %11 = vector.multi_reduction <add>, %10, %cst_6 [1] : vector<8x128xf32> to vector<8xf32>
    %12 = vector.shape_cast %11 : vector<8xf32> to vector<8x1xf32>
    %13 = math.log %12 : vector<8x1xf32>
    %14 = vector.broadcast %13 : vector<8x1xf32> to vector<8x128xf32>
    %15 = arith.subf %9, %14 : vector<8x128xf32>
    %c0_7 = arith.constant 0 : index
    %c0_8 = arith.constant 0 : index
    %16 = vector.load %arg4[%c0_7, %c0_8] : memref<8x128xf32, #tpu.memory_space<vmem>>, vector<8x128xf32>
    tpu.vector_store %arg4[%c0_7, %c0_8], %15 {strides = array<i32>} : memref<8x128xf32, #tpu.memory_space<vmem>>, vector<8x128xf32>,
    return
  }
  func.func @transform_0(%arg0: i32) -> (i32, i32) {
    %c0_i32 = arith.constant 0 : i32
    %c0_i32_0 = arith.constant 0 : i32
    return %arg0, %c0_i32 : i32, i32
  }
  func.func @transform_1(%arg0: i32) -> (i32, i32) {
    %c0_i32 = arith.constant 0 : i32
    %c0_i32_0 = arith.constant 0 : i32
    %c0_i32_1 = arith.constant 0 : i32
    return %c0_i32, %c0_i32_0 : i32, i32
  }
  func.func @transform_2(%arg0: i32) -> (i32, i32) {
    %c0_i32 = arith.constant 0 : i32
    %c0_i32_0 = arith.constant 0 : i32
    %c0_i32_1 = arith.constant 0 : i32
    return %c0_i32, %c0_i32_0 : i32, i32
  }
  func.func @transform_3(%arg0: i32) -> (i32, i32) {
    %c0_i32 = arith.constant 0 : i32
    %c0_i32_0 = arith.constant 0 : i32
    return %arg0, %c0_i32 : i32, i32
  }
}

</mosaic_0001>

<bundles_post_ra>
// kernel: classifier_forward.1
= control target key start
LH: loop header
LB: loop body
LE: loop exit
PB: predicated region body
PF: predicated region fallthrough
CT: control target
= control target key end

     0   :  { %vm35_vm0 = vcmask 261120   ;;  %s238_s1 = inlined_call_operand.vmem [shape: f32[128,32], index: 1, kind: input, shape index: {}]   ;;  %s239_s2 = inlined_call_operand.vmem [shape: f32[1,128], index: 2, kind: input, shape index: {}]   ;;  %s240_s0 = inlined_call_operand.vmem [shape: f32[8,32], index: 0, kind: input, shape index: {}]   ;;  %s241_s3 = inlined_call_operand.vmem [shape: f32[8,128], index: 3, kind: output, shape index: {}]  }
   0x1   :  { %v30_v0 = vld [vmem:[%s238_s1 + $0x78] sm:$0xff]  ;;  %v29_v1 = vld [vmem:[%s238_s1 + $0x70] sm:$0xff]  ;;  %v28_v2 = vld [vmem:[%s238_s1 + $0x68] sm:$0xff] }
   0x2   :  { %122 = vmatpush.xpose.msk.msra.mxu0 %vm35_vm0, %v30_v0  ;;  %v27_v3 = vld [vmem:[%s238_s1 + $0x60] sm:$0xff]  ;;  %v26_v4 = vld [vmem:[%s238_s1 + $0x58] sm:$0xff]  ;;  %v25_v5 = vld [vmem:[%s238_s1 + $0x50] sm:$0xff] }
   0x3   :  { %v24_v6 = vld [vmem:[%s238_s1 + $0x48] sm:$0xff]  ;;  %v23_v7 = vld [vmem:[%s238_s1 + $0x40] sm:$0xff]  ;;  %v22_v8 = vld [vmem:[%s238_s1 + $0x38] sm:$0xff] }
   0x4   :  { %v21_v9 = vld [vmem:[%s238_s1 + $0x30] sm:$0xff]  ;;  %v20_v10 = vld [vmem:[%s238_s1 + $0x28] sm:$0xff]  ;;  %v19_v11 = vld [vmem:[%s238_s1 + $0x20] sm:$0xff] }
   0x5   :  { %v18_v12 = vld [vmem:[%s238_s1 + $0x18] sm:$0xff]  ;;  %v17_v13 = vld [vmem:[%s238_s1 + $0x10] sm:$0xff]  ;;  %v16_v14 = vld [vmem:[%s238_s1 + $0x8] sm:$0xff] }
   0x6   :  { %123 = vmatpush.xpose.msk.msra.mxu0 %vm35_vm0, %v29_v1  ;;  %v15_v15 = vld [vmem:[%s238_s1] sm:$0xff] }
   0x7   :  { %v14_v16 = vld [vmem:[%s240_s0] sm:$0xff] }
   0x8   :  { %v139_v17 = vld [vmem:[%s239_s2] ss:$0 sm:$0xff] }
   0xa   :  { %124 = vmatpush.xpose.msk.msra.mxu0 %vm35_vm0, %v28_v2 }
   0xe   :  { %125 = vmatpush.xpose.msk.msra.mxu0 %vm35_vm0, %v27_v3 }
  0x12   :  { %126 = vmatpush.xpose.msk.msra.mxu0 %vm35_vm0, %v26_v4 }
  0x16   :  { %127 = vmatpush.xpose.msk.msra.mxu0 %vm35_vm0, %v25_v5 }
  0x1a   :  { %128 = vmatpush.xpose.msk.msra.mxu0 %vm35_vm0, %v24_v6 }
  0x1e   :  { %129 = vmatpush.xpose.msk.msra.mxu0 %vm35_vm0, %v23_v7 }
  0x22   :  { %130 = vmatpush.xpose.msk.msra.mxu0 %vm35_vm0, %v22_v8 }
  0x26   :  { %131 = vmatpush.xpose.msk.msra.mxu0 %vm35_vm0, %v21_v9 }
  0x2a   :  { %132 = vmatpush.xpose.msk.msra.mxu0 %vm35_vm0, %v20_v10 }
  0x2e   :  { %133 = vmatpush.xpose.msk.msra.mxu0 %vm35_vm0, %v19_v11 }
  0x32   :  { %134 = vmatpush.xpose.msk.msra.mxu0 %vm35_vm0, %v18_v12 }
  0x36   :  { %135 = vmatpush.xpose.msk.msra.mxu0 %vm35_vm0, %v17_v13 }
  0x3a   :  { %136 = vmatpush.xpose.msk.msra.mxu0 %vm35_vm0, %v16_v14 }
  0x3e   :  { %137 = vmatpush.xpose.msk.msra.mxu0 %vm35_vm0, %v15_v15 }
  0x41   :  { %138 = vmatmul.msk.f32.vlgmr.msra.gmra.mxu0 %vm35_vm0, %v14_v16 }
  0xbe   :  { %v104_v18 = vpop.f32.mrf.mxu0 }
  0xbf   :  { %v105_v19 = vadd.f32 %v139_v17, %v104_v18 }
  0xc1   :  { %107 = vmax.xlane.f32.xlu0 %v105_v19 }
 0x134   :  { %v108_v20 = vpop.xlane.xlu0 %107 }
 0x135   :  { %v109_v21 = vsub.f32 %v105_v19, %v108_v20 }
 0x137   :  { %v110_v22 = vmul.f32 1.442695, %v109_v21 }
 0x139   :  { %140 = vpow2.f32 %v110_v22 }
 0x13f   :  { %v141_v23 = vpop.eup %140 }
 0x140   :  { %112 = vadd.xlane.f32.xlu0 %v141_v23 }
 0x1b3   :  { %v113_v24 = vpop.xlane.xlu0 %112 }
 0x1b4   :  { %142 = vlog2.f32 %v113_v24 }
 0x1ba   :  { %v143_v25 = vpop.eup %142 }
 0x1bb   :  { %v115_v26 = vmul.f32 0.6931472, %v143_v25 }
 0x1bd   :  { %v116_v27 = vsub.f32 %v109_v21, %v115_v26 }
 0x1bf   :  { %117 = vst [vmem:[%s241_s3] sm:$0xff] %v116_v27 }

</bundles_post_ra>
